<compile_context>
chip_gen: v6e
topology: v6e:2x2x1
jax: 0.10.0
libtpu: 0.0.40
codegen_flags: <defaults>
</compile_context>

<pallas_src>
import functools

import jax
import jax.numpy as jnp
from jax.experimental import pallas as pl
from jax.experimental.pallas import tpu as pltpu


def _round_up(x, m):
    return (x + m - 1) // m * m


_VMEM_LIMIT_BYTES = 64 * 1024 * 1024    # request; safe on v5e/v6e/v7x
_VMEM_BUDGET_BYTES = 44 * 1024 * 1024   # self-imposed headroom for tile sizing


def ffn_kernel(x_ref, w1_ref, b1_ref, w2_ref, b2_ref, gamma_ref, beta_ref,
               o_ref, *, d_model, matmul_dtype):
    """One tile of rows: (tm, d_model_padded)."""
    x = x_ref[...].astype(jnp.float32)
    d_model_p = x.shape[-1]

    # LayerNorm (biased variance, eps inside rsqrt) == nn.LayerNorm(eps=1e-6).
    # Padded columns (if any) are masked out of the statistics; gamma/beta are
    # zero-padded, so xn is exactly 0 in the padding.
    if d_model_p == d_model:
        mu = jnp.mean(x, axis=-1, keepdims=True)
        xc = x - mu
        var = jnp.mean(xc * xc, axis=-1, keepdims=True)
    else:
        col = jax.lax.broadcasted_iota(jnp.int32, x.shape, dimension=1)
        mask = (col < d_model).astype(jnp.float32)
        inv_d = 1.0 / d_model
        mu = jnp.sum(x * mask, axis=-1, keepdims=True) * inv_d
        xc = (x - mu) * mask
        var = jnp.sum(xc * xc, axis=-1, keepdims=True) * inv_d
    xn = (x - mu) * jax.lax.rsqrt(var + 1e-6)
    xn = xn * gamma_ref[...].astype(jnp.float32) + beta_ref[...].astype(jnp.float32)

    # w_1: d_model -> d_ff, ReLU (dropout_1 identity in eval).
    # Matmul operands in matmul_dtype (bf16 by default), f32 accumulation.
    h = jnp.dot(xn.astype(matmul_dtype), w1_ref[...],
                preferred_element_type=jnp.float32)
    h = jnp.maximum(h + b1_ref[...].astype(jnp.float32), 0.0)

    # w_2: d_ff -> d_model (dropout_2 identity), residual add of the raw input.
    y = jnp.dot(h.astype(matmul_dtype), w2_ref[...],
                preferred_element_type=jnp.float32)
    y = y + b2_ref[...].astype(jnp.float32)
    o_ref[...] = (y + x).astype(o_ref.dtype)


def _pick_tm(N, d_model_p, d_ff_p, x_itemsize, out_itemsize, w_itemsize, tm_max):
    """Largest row tile (multiple of 8) whose working set fits the VMEM budget."""
    # Weights are double-buffered by the pipeline even with constant index maps.
    fixed = 2 * 2 * d_model_p * d_ff_p * w_itemsize          # w1 + w2
    fixed += 2 * 4 * (d_ff_p + 3 * d_model_p)                # b1, b2, gamma, beta
    tm = min(tm_max, _round_up(N, 8))
    while tm > 8:
        live = (2 * tm * d_model_p * (x_itemsize + out_itemsize)  # x/out, 2 bufs
                + tm * 4 * (d_model_p + d_ff_p)                   # xn, h (f32)
                + tm * w_itemsize * (d_model_p + d_ff_p))         # matmul operands
        if fixed + live <= _VMEM_BUDGET_BYTES:
            break
        tm = max(8, _round_up(tm // 2, 8))
    return max(tm, 8)


def positionwise_ffn(x, w1, b1, w2, b2, gamma, beta, *,
                     tm=512, matmul_dtype=jnp.bfloat16):
    """x: [B, L, d_model]; w1: [d_model, d_ff]; w2: [d_ff, d_model]."""
    B, L, d_model = x.shape
    d_ff = w1.shape[1]
    N = B * L

    # Lane-dense padding of feature dims; sublane-friendly row tiling.
    d_model_p = _round_up(d_model, 128)
    d_ff_p = _round_up(d_ff, 128)

    f32 = jnp.float32
    x_isize = jnp.dtype(x.dtype).itemsize
    w_isize = jnp.dtype(matmul_dtype).itemsize
    tm_eff = _pick_tm(N, d_model_p, d_ff_p, x_isize, x_isize, w_isize, tm)
    N_p = _round_up(N, tm_eff)

    # x stays in its native dtype (cast to f32 inside the kernel).
    x2 = jnp.pad(x.reshape(N, d_model), ((0, N_p - N), (0, d_model_p - d_model)))
    w1p = jnp.pad(w1, ((0, d_model_p - d_model), (0, d_ff_p - d_ff))).astype(matmul_dtype)
    w2p = jnp.pad(w2, ((0, d_ff_p - d_ff), (0, d_model_p - d_model))).astype(matmul_dtype)
    b1p = jnp.pad(b1.astype(f32), (0, d_ff_p - d_ff)).reshape(1, d_ff_p)
    b2p = jnp.pad(b2.astype(f32), (0, d_model_p - d_model)).reshape(1, d_model_p)
    gp = jnp.pad(gamma.astype(f32), (0, d_model_p - d_model)).reshape(1, d_model_p)
    bp = jnp.pad(beta.astype(f32), (0, d_model_p - d_model)).reshape(1, d_model_p)

    cost = pl.CostEstimate(
        flops=4 * N_p * d_model_p * d_ff_p,               # two matmuls
        transcendentals=N_p,                              # one rsqrt per row
        bytes_accessed=(2 * N_p * d_model_p * x_isize     # x in + out
                        + 2 * d_model_p * d_ff_p * w_isize
                        + (3 * d_model_p + d_ff_p) * 4),
    )

    kernel = functools.partial(ffn_kernel, d_model=d_model,
                               matmul_dtype=matmul_dtype)

    out = pl.pallas_call(
        kernel,
        out_shape=jax.ShapeDtypeStruct((N_p, d_model_p), x.dtype),
        grid_spec=pltpu.PrefetchScalarGridSpec(
            num_scalar_prefetch=0,
            grid=(N_p // tm_eff,),
            in_specs=[
                pl.BlockSpec((tm_eff, d_model_p), lambda i: (i, 0)),   # x rows
                pl.BlockSpec((d_model_p, d_ff_p), lambda i: (0, 0)),   # w1
                pl.BlockSpec((1, d_ff_p), lambda i: (0, 0)),           # b1
                pl.BlockSpec((d_ff_p, d_model_p), lambda i: (0, 0)),   # w2
                pl.BlockSpec((1, d_model_p), lambda i: (0, 0)),        # b2
                pl.BlockSpec((1, d_model_p), lambda i: (0, 0)),        # gamma
                pl.BlockSpec((1, d_model_p), lambda i: (0, 0)),        # beta
            ],
            out_specs=pl.BlockSpec((tm_eff, d_model_p), lambda i: (i, 0)),
        ),
        compiler_params=pltpu.CompilerParams(
            dimension_semantics=("parallel",),             # megacore shards rows
            vmem_limit_bytes=_VMEM_LIMIT_BYTES,
        ),
        cost_estimate=cost,
    )(x2, w1p, b1p, w2p, b2p, gp, bp)

    return out[:N, :d_model].reshape(B, L, d_model)


def reference_ffn(x, w1, b1, w2, b2, gamma, beta):
    xf = x.astype(jnp.float32)
    mu = jnp.mean(xf, axis=-1, keepdims=True)
    var = jnp.mean((xf - mu) ** 2, axis=-1, keepdims=True)
    xn = (xf - mu) / jnp.sqrt(var + 1e-6) * gamma + beta
    h = jnp.maximum(xn @ w1 + b1, 0.0)
    y = h @ w2 + b2
    return (y + xf).astype(x.dtype)


if __name__ == "__main__":
    batch, seq, d_model, d_ff = 2, 8, 32, 64

    key = jax.random.PRNGKey(0)
    kx, kw1, kb1, kw2, kb2 = jax.random.split(key, 5)

    x = jax.random.normal(kx, (batch, seq, d_model), dtype=jnp.float32)

    # Deterministic "xavier-like" init for the two Linear layers.
    lim1 = (6.0 / (d_model + d_ff)) ** 0.5
    lim2 = (6.0 / (d_ff + d_model)) ** 0.5
    w1 = jax.random.uniform(kw1, (d_model, d_ff), minval=-lim1, maxval=lim1,
                            dtype=jnp.float32)
    b1 = jax.random.uniform(kb1, (d_ff,), minval=-0.1, maxval=0.1,
                            dtype=jnp.float32)
    w2 = jax.random.uniform(kw2, (d_ff, d_model), minval=-lim2, maxval=lim2,
                            dtype=jnp.float32)
    b2 = jax.random.uniform(kb2, (d_model,), minval=-0.1, maxval=0.1,
                            dtype=jnp.float32)
    gamma = jnp.ones((d_model,), dtype=jnp.float32)
    beta = jnp.zeros((d_model,), dtype=jnp.float32)

    ref = reference_ffn(x, w1, b1, w2, b2, gamma, beta)

    # Exact-precision path (f32 matmul operands) -- tight tolerance.
    out_f32 = positionwise_ffn(x, w1, b1, w2, b2, gamma, beta,
                               matmul_dtype=jnp.float32)
    out_f32 = jax.block_until_ready(out_f32)
    assert out_f32.shape == (batch, seq, d_model)
    assert jnp.allclose(out_f32, ref, atol=1e-4, rtol=1e-4), "f32 path mismatch"

    # Fast path (bf16 MXU operands, f32 accumulation) -- looser tolerance.
    out_bf16 = positionwise_ffn(x, w1, b1, w2, b2, gamma, beta)
    out_bf16 = jax.block_until_ready(out_bf16)
    assert out_bf16.shape == (batch, seq, d_model)
    assert jnp.allclose(out_bf16, ref, atol=5e-2, rtol=5e-2), "bf16 path mismatch"

    print("KERNEL_OK")
</pallas_src>

<mosaic_0001>
module attributes {stable_mosaic.version = 11 : i64} {
  func.func @ffn_kernel(%arg0: i32, %arg1: memref<16x128xf32, #tpu.memory_space<vmem>>, %arg2: memref<128x128xf32, #tpu.memory_space<vmem>>, %arg3: memref<1x128xf32, #tpu.memory_space<vmem>>, %arg4: memref<128x128xf32, #tpu.memory_space<vmem>>, %arg5: memref<1x128xf32, #tpu.memory_space<vmem>>, %arg6: memref<1x128xf32, #tpu.memory_space<vmem>>, %arg7: memref<1x128xf32, #tpu.memory_space<vmem>>, %arg8: memref<16x128xf32, #tpu.memory_space<vmem>>) attributes {dimension_semantics = [#tpu.dimension_semantics<parallel>], iteration_bounds = array<i64: 1>, scalar_prefetch = 0 : i64, scratch_operands = 0 : i64, tpu.core_type = #tpu.core_type<tc>, window_params = [{transform_indices = @transform_0, window_bounds = array<i64: 16, 128>}, {pipeline_mode = #tpu.pipeline_mode<synchronous>, transform_indices = @transform_1, window_bounds = array<i64: 128, 128>}, {pipeline_mode = #tpu.pipeline_mode<synchronous>, transform_indices = @transform_2, window_bounds = array<i64: 1, 128>}, {pipeline_mode = #tpu.pipeline_mode<synchronous>, transform_indices = @transform_3, window_bounds = array<i64: 128, 128>}, {pipeline_mode = #tpu.pipeline_mode<synchronous>, transform_indices = @transform_4, window_bounds = array<i64: 1, 128>}, {pipeline_mode = #tpu.pipeline_mode<synchronous>, transform_indices = @transform_5, window_bounds = array<i64: 1, 128>}, {pipeline_mode = #tpu.pipeline_mode<synchronous>, transform_indices = @transform_6, window_bounds = array<i64: 1, 128>}, {transform_indices = @transform_7, window_bounds = array<i64: 16, 128>}]} {
    %c0 = arith.constant 0 : index
    %c0_0 = arith.constant 0 : index
    %0 = vector.load %arg1[%c0, %c0_0] : memref<16x128xf32, #tpu.memory_space<vmem>>, vector<16x128xf32>
    %1 = tpu.iota {dimensions = array<i32: 1>} : vector<16x128xi32>
    %c32_i32 = arith.constant 32 : i32
    %2 = vector.broadcast %c32_i32 : i32 to vector<16x128xi32>
    %3 = arith.cmpi slt, %1, %2 : vector<16x128xi32>
    %4 = arith.extui %3 : vector<16x128xi1> to vector<16x128xi32>
    %5 = arith.sitofp %4 : vector<16x128xi32> to vector<16x128xf32>
    %6 = arith.mulf %0, %5 : vector<16x128xf32>
    %cst = arith.constant dense<0.000000e+00> : vector<16xf32>
    %7 = vector.multi_reduction <add>, %6, %cst [1] : vector<16x128xf32> to vector<16xf32>
    %8 = vector.shape_cast %7 : vector<16xf32> to vector<16x1xf32>
    %cst_1 = arith.constant 3.125000e-02 : f32
    %9 = vector.broadcast %cst_1 : f32 to vector<16x1xf32>
    %10 = arith.mulf %8, %9 : vector<16x1xf32>
    %11 = vector.broadcast %10 : vector<16x1xf32> to vector<16x128xf32>
    %12 = arith.subf %0, %11 : vector<16x128xf32>
    %13 = arith.mulf %12, %5 : vector<16x128xf32>
    %14 = arith.mulf %13, %13 : vector<16x128xf32>
    %cst_2 = arith.constant dense<0.000000e+00> : vector<16xf32>
    %15 = vector.multi_reduction <add>, %14, %cst_2 [1] : vector<16x128xf32> to vector<16xf32>
    %16 = vector.shape_cast %15 : vector<16xf32> to vector<16x1xf32>
    %cst_3 = arith.constant 3.125000e-02 : f32
    %17 = vector.broadcast %cst_3 : f32 to vector<16x1xf32>
    %18 = arith.mulf %16, %17 : vector<16x1xf32>
    %19 = vector.broadcast %10 : vector<16x1xf32> to vector<16x128xf32>
    %20 = arith.subf %0, %19 : vector<16x128xf32>
    %cst_4 = arith.constant 9.99999997E-7 : f32
    %21 = vector.broadcast %cst_4 : f32 to vector<16x1xf32>
    %22 = arith.addf %18, %21 : vector<16x1xf32>
    %23 = math.rsqrt %22 : vector<16x1xf32>
    %24 = vector.broadcast %23 : vector<16x1xf32> to vector<16x128xf32>
    %25 = arith.mulf %20, %24 : vector<16x128xf32>
    %c0_5 = arith.constant 0 : index
    %c0_6 = arith.constant 0 : index
    %26 = vector.load %arg6[%c0_5, %c0_6] : memref<1x128xf32, #tpu.memory_space<vmem>>, vector<1x128xf32>
    %27 = vector.broadcast %26 : vector<1x128xf32> to vector<16x128xf32>
    %28 = arith.mulf %25, %27 : vector<16x128xf32>
    %c0_7 = arith.constant 0 : index
    %c0_8 = arith.constant 0 : index
    %29 = vector.load %arg7[%c0_7, %c0_8] : memref<1x128xf32, #tpu.memory_space<vmem>>, vector<1x128xf32>
    %30 = vector.broadcast %29 : vector<1x128xf32> to vector<16x128xf32>
    %31 = arith.addf %28, %30 : vector<16x128xf32>
    %c0_9 = arith.constant 0 : index
    %c0_10 = arith.constant 0 : index
    %32 = vector.load %arg2[%c0_9, %c0_10] : memref<128x128xf32, #tpu.memory_space<vmem>>, vector<128x128xf32>
    %cst_11 = arith.constant dense<0.000000e+00> : vector<16x128xf32>
    %33 = tpu.matmul %31, %32, %cst_11 {dimension_numbers = #tpu.dot_dimension_numbers<[1], [0], [0], [1], [0, 0, 1, 1], [], []>} : vector<16x128xf32>, vector<128x128xf32>, vector<16x128xf32> -> vector<16x128xf32>
    %c0_12 = arith.constant 0 : index
    %c0_13 = arith.constant 0 : index
    %34 = vector.load %arg3[%c0_12, %c0_13] : memref<1x128xf32, #tpu.memory_space<vmem>>, vector<1x128xf32>
    %35 = vector.broadcast %34 : vector<1x128xf32> to vector<16x128xf32>
    %36 = arith.addf %33, %35 : vector<16x128xf32>
    %cst_14 = arith.constant 0.000000e+00 : f32
    %37 = vector.broadcast %cst_14 : f32 to vector<16x128xf32>
    %38 = arith.maximumf %36, %37 : vector<16x128xf32>
    %c0_15 = arith.constant 0 : index
    %c0_16 = arith.constant 0 : index
    %39 = vector.load %arg4[%c0_15, %c0_16] : memref<128x128xf32, #tpu.memory_space<vmem>>, vector<128x128xf32>
    %cst_17 = arith.constant dense<0.000000e+00> : vector<16x128xf32>
    %40 = tpu.matmul %38, %39, %cst_17 {dimension_numbers = #tpu.dot_dimension_numbers<[1], [0], [0], [1], [0, 0, 1, 1], [], []>} : vector<16x128xf32>, vector<128x128xf32>, vector<16x128xf32> -> vector<16x128xf32>
    %c0_18 = arith.constant 0 : index
    %c0_19 = arith.constant 0 : index
    %41 = vector.load %arg5[%c0_18, %c0_19] : memref<1x128xf32, #tpu.memory_space<vmem>>, vector<1x128xf32>
    %42 = vector.broadcast %41 : vector<1x128xf32> to vector<16x128xf32>
    %43 = arith.addf %40, %42 : vector<16x128xf32>
    %44 = arith.addf %43, %0 : vector<16x128xf32>
    %c0_20 = arith.constant 0 : index
    %c0_21 = arith.constant 0 : index
    %45 = vector.load %arg8[%c0_20, %c0_21] : memref<16x128xf32, #tpu.memory_space<vmem>>, vector<16x128xf32>
    tpu.vector_store %arg8[%c0_20, %c0_21], %44 {strides = array<i32>} : memref<16x128xf32, #tpu.memory_space<vmem>>, vector<16x128xf32>,
    return
  }
  func.func @transform_0(%arg0: i32) -> (i32, i32) {
    %c0_i32 = arith.constant 0 : i32
    %c0_i32_0 = arith.constant 0 : i32
    return %arg0, %c0_i32 : i32, i32
  }
  func.func @transform_1(%arg0: i32) -> (i32, i32) {
    %c0_i32 = arith.constant 0 : i32
    %c0_i32_0 = arith.constant 0 : i32
    %c0_i32_1 = arith.constant 0 : i32
    return %c0_i32, %c0_i32_0 : i32, i32
  }
  func.func @transform_2(%arg0: i32) -> (i32, i32) {
    %c0_i32 = arith.constant 0 : i32
    %c0_i32_0 = arith.constant 0 : i32
    %c0_i32_1 = arith.constant 0 : i32
    return %c0_i32, %c0_i32_0 : i32, i32
  }
  func.func @transform_3(%arg0: i32) -> (i32, i32) {
    %c0_i32 = arith.constant 0 : i32
    %c0_i32_0 = arith.constant 0 : i32
    %c0_i32_1 = arith.constant 0 : i32
    return %c0_i32, %c0_i32_0 : i32, i32
  }
  func.func @transform_4(%arg0: i32) -> (i32, i32) {
    %c0_i32 = arith.constant 0 : i32
    %c0_i32_0 = arith.constant 0 : i32
    %c0_i32_1 = arith.constant 0 : i32
    return %c0_i32, %c0_i32_0 : i32, i32
  }
  func.func @transform_5(%arg0: i32) -> (i32, i32) {
    %c0_i32 = arith.constant 0 : i32
    %c0_i32_0 = arith.constant 0 : i32
    %c0_i32_1 = arith.constant 0 : i32
    return %c0_i32, %c0_i32_0 : i32, i32
  }
  func.func @transform_6(%arg0: i32) -> (i32, i32) {
    %c0_i32 = arith.constant 0 : i32
    %c0_i32_0 = arith.constant 0 : i32
    %c0_i32_1 = arith.constant 0 : i32
    return %c0_i32, %c0_i32_0 : i32, i32
  }
  func.func @transform_7(%arg0: i32) -> (i32, i32) {
    %c0_i32 = arith.constant 0 : i32
    %c0_i32_0 = arith.constant 0 : i32
    return %arg0, %c0_i32 : i32, i32
  }
}

</mosaic_0001>

<bundles_post_ra>
// kernel: tpu_custom_call.1
= control target key start
LH: loop header
LB: loop body
LE: loop exit
PB: predicated region body
PF: predicated region fallthrough
CT: control target
= control target key end

     0   :  { %12 = vsyncpa [#allocation3], 0  ;;  %s648_s0 = inlined_call_operand.hbm [shape: f32[16,128], index: 0, kind: input, shape index: {}]   ;;  %s649_s1 = inlined_call_operand.hbm [shape: f32[128,128], index: 1, kind: input, shape index: {}]   ;;  %s650_s2 = inlined_call_operand.vmem [shape: f32[1,128], index: 2, kind: input, shape index: {}]   ;;  %s651_s3 = inlined_call_operand.hbm [shape: f32[128,128], index: 3, kind: input, shape index: {}]   ;;  %s652_s4 = inlined_call_operand.vmem [shape: f32[1,128], index: 4, kind: input, shape index: {}]   ;;  %s653_s5 = inlined_call_operand.vmem [shape: f32[1,128], index: 5, kind: input, shape index: {}]   ;;  %s654_s6 = inlined_call_operand.vmem [shape: f32[1,128], index: 6, kind: input, shape index: {}]   ;;  %s655_s7 = inlined_call_operand.hbm [shape: f32[16,128], index: 7, kind: output, shape index: {}]  }
   0x1   :  { %13 = vsyncpa [#allocation6], 0 }
   0x2   :  { %14 = vsyncpa [#allocation4], 0  ;;  %s547_s24 = smov [#allocation5]   ;;  %s548_s26 = smov [#allocation2]  }
   0x3   :  { %s32_s25 = sshll.u32 %s547_s24, 4  ;;  %s20_s27 = sshll.u32 %s548_s26, 4  ;;  %s33_s25 = int_to_ptr.vmem [resolvable:$true] %s32_s25  ;;  %s21_s27 = int_to_ptr.vmem [resolvable:$true] %s20_s27 }
   0x4   :  { %s469_s28 = scalar_lea.vmem %s33_s25, 2048  ;;  %p474_p1 = scmp.lt.s32.totalorder %s33_s25, %s33_s25 }
   0x5   :  { %p470_p0 = scmp.ne.s32.totalorder %s33_s25, %s469_s28  ;;  %p475_p2 = scmp.lt.s32.totalorder %s469_s28, %s469_s28 }
   0x7   :  { %p476_p3 = por %p475_p2, %p474_p1 }
   0x9   :  { %p477_p4 = pnand %p476_p3, %p470_p0 }
   0xb   :  { %480 = shalt.err (!%p477_p4)
}
   0xc   :  { %s549_s29 = smov 128   ;;  %s550_s30 = smov 8  }
   0xd   :  { %38 = dma.hbm_to_vmem [thread:$0]  %s649_s1, 2048, %s33_s25, [#allocation6], %s549_s29, %s549_s29, %s550_s30  }
   0xe   :  { %s489_s10 = scalar_lea.vmem %s21_s27, 256  ;;  %p494_p6 = scmp.lt.s32.totalorder %s21_s27, %s21_s27 }
   0xf   :  { %p490_p5 = scmp.ne.s32.totalorder %s21_s27, %s489_s10  ;;  %p495_p7 = scmp.lt.s32.totalorder %s489_s10, %s489_s10 }
  0x11   :  { %p496_p8 = por %p495_p7, %p494_p6 }
  0x13   :  { %p497_p9 = pnand %p496_p8, %p490_p5 }
  0x15   :  { %500 = shalt.err (!%p497_p9)
}
  0x16   :  { %26 = dma.hbm_to_vmem [thread:$0]  %s648_s0, 256, %s21_s27, [#allocation3], %s549_s29, %s549_s29, %s550_s30  }
  0x17   :  { %s551_s13 = smov [#allocation7]  }
  0x18   :  { %s46_s14 = sshll.u32 %s551_s13, 4  ;;  %s47_s14 = int_to_ptr.vmem [resolvable:$true] %s46_s14 }
  0x19   :  { %s509_s15 = scalar_lea.vmem %s47_s14, 2048  ;;  %p514_p11 = scmp.lt.s32.totalorder %s47_s14, %s47_s14 }
  0x1a   :  { %p510_p10 = scmp.ne.s32.totalorder %s47_s14, %s509_s15  ;;  %p515_p12 = scmp.lt.s32.totalorder %s509_s15, %s509_s15 }
  0x1c   :  { %p516_p13 = por %p515_p12, %p514_p11 }
  0x1e   :  { %p517_p0 = pnand %p516_p13, %p510_p10 }
  0x20   :  { %520 = shalt.err (!%p517_p0)
}
  0x21   :  { %52 = dma.hbm_to_vmem [thread:$0]  %s651_s3, 2048, %s47_s14, [#allocation6], %s549_s29, %s549_s29, %s550_s30  }
  0x22   :  { %541 = dma.done.wait [#allocation3], 256  }
  0x23   :  { %542 = vsyncadd [#allocation3], 4294967040 }
  0x24   :  { %543 = dma.done.wait [#allocation6], 4096  }
  0x25   :  { %544 = vsyncadd [#allocation6], 4294963200  ;;  %v70_v0 = vlaneseq  ;;  %v552_v2 = vmov 0.0   ;;  %v612_v4 = vld [vmem:[#allocation2] sm:$0xff]  ;;  %v614_v5 = vld [vmem:[#allocation2 + $0x8] sm:$0xff]  ;;  %s553_s21 = smov [#allocation8]  }
  0x26   :  { %v134_v8 = vld [vmem:[#allocation5 + $0x78] sm:$0xff]  ;;  %v133_v9 = vld [vmem:[#allocation5 + $0x70] sm:$0xff]  ;;  %v132_v20 = vld [vmem:[#allocation5 + $0x68] sm:$0xff]  ;;  %s326_s22 = sshll.u32 %s553_s21, 4  ;;  %s327_s22 = int_to_ptr.vmem [resolvable:$true] %s326_s22 }
  0x27   :  { %v71_v1 = vand.u32 127, %v70_v0  ;;  %380 = vmatprep.subr.mxu0 %v134_v8  ;;  %v131_v21 = vld [vmem:[#allocation5 + $0x60] sm:$0xff]  ;;  %v130_v22 = vld [vmem:[#allocation5 + $0x58] sm:$0xff]  ;;  %v129_v23 = vld [vmem:[#allocation5 + $0x50] sm:$0xff]  ;;  %p526_p2 = scmp.lt.s32.totalorder %s327_s22, %s327_s22 }
  0x28   :  { %381 = vmatpush3.msra.mxu0 %v134_v8  ;;  %v128_v24 = vld [vmem:[#allocation5 + $0x48] sm:$0xff]  ;;  %v127_v25 = vld [vmem:[#allocation5 + $0x40] sm:$0xff]  ;;  %v126_v26 = vld [vmem:[#allocation5 + $0x38] sm:$0xff] }
  0x29   :  { %vm72_vm0 = vcmp.lt.s32.totalorder %v71_v1, 32  ;;  %382 = vmatprep.subr.mxu0 %v133_v9  ;;  %v125_v27 = vld [vmem:[#allocation5 + $0x30] sm:$0xff]  ;;  %v124_v28 = vld [vmem:[#allocation5 + $0x28] sm:$0xff]  ;;  %v123_v29 = vld [vmem:[#allocation5 + $0x20] sm:$0xff] }
  0x2a   :  { %v339_v3 = vsel %vm72_vm0, 1.0, %v552_v2  ;;  %383 = vmatpush3.msra.mxu0 %v133_v9  ;;  %v122_v30 = vld [vmem:[#allocation5 + $0x18] sm:$0xff]  ;;  %v121_v31 = vld [vmem:[#allocation5 + $0x10] sm:$0xff]  ;;  %v120_v32 = vld [vmem:[#allocation5 + $0x8] sm:$0xff] }
  0x2b   :  { %v75_v6 = vmul.f32 %v339_v3, %v612_v4  ;;  %v76_v7 = vmul.f32 %v339_v3, %v614_v5  ;;  %384 = vmatprep.subr.mxu0 %v132_v20  ;;  %v119_v33 = vld [vmem:[#allocation5] sm:$0xff]  ;;  %v234_v34 = vld [vmem:[#allocation7 + $0x78] sm:$0xff]  ;;  %v233_v35 = vld [vmem:[#allocation7 + $0x70] sm:$0xff] }
  0x2c   :  { %385 = vmatpush3.msra.mxu0 %v132_v20  ;;  %415 = vmatprep.subr.mxu1 %v234_v34  ;;  %v232_v36 = vld [vmem:[#allocation7 + $0x68] sm:$0xff]  ;;  %v231_v37 = vld [vmem:[#allocation7 + $0x60] sm:$0xff]  ;;  %v230_v38 = vld [vmem:[#allocation7 + $0x58] sm:$0xff] }
  0x2d   :  { %77 = vadd.xlane.f32.xlu0 %v75_v6  ;;  %386 = vmatprep.subr.mxu0 %v131_v21  ;;  %v229_v39 = vld [vmem:[#allocation7 + $0x50] sm:$0xff]  ;;  %v228_v40 = vld [vmem:[#allocation7 + $0x48] sm:$0xff]  ;;  %v227_v41 = vld [vmem:[#allocation7 + $0x40] sm:$0xff] }
  0x2e   :  { %387 = vmatpush3.msra.mxu0 %v131_v21  ;;  %416 = vmatpush3.msra.mxu1 %v234_v34  ;;  %v226_v42 = vld [vmem:[#allocation7 + $0x38] sm:$0xff]  ;;  %v225_v43 = vld [vmem:[#allocation7 + $0x30] sm:$0xff]  ;;  %v224_v44 = vld [vmem:[#allocation7 + $0x28] sm:$0xff] }
  0x2f   :  { %388 = vmatprep.subr.mxu0 %v130_v22  ;;  %417 = vmatprep.subr.mxu1 %v233_v35  ;;  %v223_v45 = vld [vmem:[#allocation7 + $0x20] sm:$0xff]  ;;  %v340_v53 = vld [vmem:[%s653_s5] ss:$0 sm:$0xff]  ;;  %v222_v62 = vld [vmem:[#allocation7 + $0x18] sm:$0xff] }
  0x30   :  { %389 = vmatpush3.msra.mxu0 %v130_v22  ;;  %418 = vmatpush3.msra.mxu1 %v233_v35  ;;  %v341_v55 = vld [vmem:[%s654_s6] ss:$0 sm:$0xff]  ;;  %v220_v0 = vld [vmem:[#allocation7 + $0x8] sm:$0xff]  ;;  %v219_v1 = vld [vmem:[#allocation7] sm:$0xff] }
  0x31   :  { %79 = vadd.xlane.f32.xlu0 %v76_v7  ;;  %390 = vmatprep.subr.mxu0 %v129_v23  ;;  %v221_v63 = vld [vmem:[#allocation7 + $0x10] sm:$0xff] }
  0x32   :  { %391 = vmatpush3.msra.mxu0 %v129_v23  ;;  %419 = vmatprep.subr.mxu1 %v232_v36  ;;  %v342_v2 = vld [vmem:[%s650_s2] ss:$0 sm:$0xff]  ;;  %s521_s2 = scalar_lea.vmem %s327_s22, 256 }
  0x33   :  { %392 = vmatprep.subr.mxu0 %v128_v24  ;;  %420 = vmatpush3.msra.mxu1 %v232_v36  ;;  %p522_p1 = scmp.ne.s32.totalorder %s327_s22, %s521_s2  ;;  %p527_p3 = scmp.lt.s32.totalorder %s521_s2, %s521_s2 }
  0x34   :  { %393 = vmatpush3.msra.mxu0 %v128_v24  ;;  %421 = vmatprep.subr.mxu1 %v231_v37 }
  0x35   :  { %394 = vmatprep.subr.mxu0 %v127_v25  ;;  %422 = vmatpush3.msra.mxu1 %v231_v37  ;;  %p528_p4 = por %p527_p3, %p526_p2 }
  0x36   :  { %395 = vmatpush3.msra.mxu0 %v127_v25  ;;  %423 = vmatprep.subr.mxu1 %v230_v38 }
  0x37   :  { %396 = vmatprep.subr.mxu0 %v126_v26  ;;  %424 = vmatpush3.msra.mxu1 %v230_v38  ;;  %p529_p5 = pnand %p528_p4, %p522_p1 }
  0x38   :  { %397 = vmatpush3.msra.mxu0 %v126_v26  ;;  %425 = vmatprep.subr.mxu1 %v229_v39 }
  0x39   :  { %398 = vmatprep.subr.mxu0 %v125_v27  ;;  %426 = vmatpush3.msra.mxu1 %v229_v39 }
  0x3a   :  { %399 = vmatpush3.msra.mxu0 %v125_v27  ;;  %427 = vmatprep.subr.mxu1 %v228_v40 }
  0x3b   :  { %400 = vmatprep.subr.mxu0 %v124_v28  ;;  %428 = vmatpush3.msra.mxu1 %v228_v40 }
  0x3c   :  { %401 = vmatpush3.msra.mxu0 %v124_v28  ;;  %429 = vmatprep.subr.mxu1 %v227_v41 }
  0x3d   :  { %402 = vmatprep.subr.mxu0 %v123_v29  ;;  %430 = vmatpush3.msra.mxu1 %v227_v41 }
  0x3e   :  { %403 = vmatpush3.msra.mxu0 %v123_v29  ;;  %431 = vmatprep.subr.mxu1 %v226_v42 }
  0x3f   :  { %404 = vmatprep.subr.mxu0 %v122_v30  ;;  %432 = vmatpush3.msra.mxu1 %v226_v42 }
  0x40   :  { %405 = vmatpush3.msra.mxu0 %v122_v30  ;;  %433 = vmatprep.subr.mxu1 %v225_v43 }
  0x41   :  { %406 = vmatprep.subr.mxu0 %v121_v31  ;;  %434 = vmatpush3.msra.mxu1 %v225_v43 }
  0x42   :  { %407 = vmatpush3.msra.mxu0 %v121_v31  ;;  %435 = vmatprep.subr.mxu1 %v224_v44 }
  0x43   :  { %408 = vmatprep.subr.mxu0 %v120_v32  ;;  %436 = vmatpush3.msra.mxu1 %v224_v44 }
  0x44   :  { %409 = vmatpush3.msra.mxu0 %v120_v32  ;;  %437 = vmatprep.subr.mxu1 %v223_v45 }
  0x45   :  { %410 = vmatprep.subr.mxu0 %v119_v33  ;;  %438 = vmatpush3.msra.mxu1 %v223_v45 }
  0x46   :  { %411 = vmatpush3.msra.mxu0 %v119_v33  ;;  %439 = vmatprep.subr.mxu1 %v222_v62 }
  0x47   :  { %440 = vmatpush3.msra.mxu1 %v222_v62 }
  0x48   :  { %441 = vmatprep.subr.mxu1 %v221_v63 }
  0x49   :  { %442 = vmatpush3.msra.mxu1 %v221_v63 }
  0x4a   :  { %443 = vmatprep.subr.mxu1 %v220_v0 }
  0x4b   :  { %444 = vmatpush3.msra.mxu1 %v220_v0 }
  0x4c   :  { %445 = vmatprep.subr.mxu1 %v219_v1 }
  0x4d   :  { %446 = vmatpush3.msra.mxu1 %v219_v1 }
  0xb6   :  { %v78_v10 = vpop.xlane.xlu0 %77 }
  0xb7   :  { %v81_v11 = vmul.f32 0.03125, %v78_v10 }
  0xb9   :  { %v619_v12 = vsub.f32 %v612_v4, %v81_v11  ;;  %v343_v11 = vld [vmem:[%s652_s4] ss:$0 sm:$0xff] }
  0xba   :  { %v80_v13 = vpop.xlane.xlu0 %79 }
  0xbb   :  { %v82_v14 = vmul.f32 0.03125, %v80_v13  ;;  %v85_v15 = vmul.f32 %v339_v3, %v619_v12 }
  0xbd   :  { %v623_v16 = vsub.f32 %v614_v5, %v82_v14  ;;  %v87_v17 = vmul.f32 %v85_v15, %v85_v15 }
  0xbf   :  { %89 = vadd.xlane.f32.xlu1 %v87_v17  ;;  %v86_v18 = vmul.f32 %v339_v3, %v623_v16 }
  0xc1   :  { %v88_v19 = vmul.f32 %v86_v18, %v86_v18 }
  0xc3   :  { %91 = vadd.xlane.f32.xlu1 %v88_v19 }
 0x148   :  { %v90_v46 = vpop.xlane.xlu1 %89 }
 0x149   :  { %v93_v47 = vmul.f32 0.03125, %v90_v46 }
 0x14b   :  { %v95_v48 = vadd.f32 1e-06, %v93_v47 }
 0x14c   :  { %v92_v49 = vpop.xlane.xlu1 %91 }
 0x14d   :  { %457 = vrsqrt.f32 %v95_v48  ;;  %v94_v50 = vmul.f32 0.03125, %v92_v49 }
 0x14f   :  { %v96_v51 = vadd.f32 1e-06, %v94_v50 }
 0x151   :  { %459 = vrsqrt.f32 %v96_v51 }
 0x15a   :  { %v458_v52 = vpop.eup %457 }
 0x15b   :  { %v99_v54 = vmul.f32 %v458_v52, %v619_v12 }
 0x15d   :  { %v108_v56 = vmul.f32 %v340_v53, %v99_v54 }
 0x15e   :  { %v460_v57 = vpop.eup %459 }
 0x15f   :  { %v100_v58 = vmul.f32 %v460_v57, %v623_v16  ;;  %v117_v59 = vadd.f32 %v341_v55, %v108_v56 }
 0x161   :  { %v109_v60 = vmul.f32 %v340_v53, %v100_v58  ;;  %412 = vmatprep.mubr.f32.mxu0 %v117_v59 }
 0x163   :  { %v118_v61 = vadd.f32 %v341_v55, %v109_v60 }
 0x165   :  { %413 = vmatmul.mubr.f32.vlgmr.msra.gmra.mxu0 %v118_v61 }
 0x225   :  { %v414_v3 = vpop.f32.mrf.mxu0 }
 0x226   :  { %v214_v6 = vadd.f32 %v414_v3, %v342_v2 }
 0x227   :  { %v208_v7 = vpop.f32.mrf.mxu0 }
 0x228   :  { %v209_v8 = vadd.f32 %v342_v2, %v208_v7  ;;  %v218_v10 = vmax.f32 %v214_v6, 0.0 }
 0x22a   :  { %v217_v9 = vmax.f32 %v209_v8, 0.0 }
 0x22c   :  { %447 = vmatprep.mubr.f32.mxu1 %v217_v9 }
 0x22d   :  { %448 = vmatmul.mubr.f32.vlgmr.msra.gmra.mxu1 %v218_v10 }
 0x2ed   :  { %v449_v12 = vpop.f32.mrf.mxu1 }
 0x2ee   :  { %v314_v13 = vadd.f32 %v449_v12, %v343_v11 }
 0x2ef   :  { %v308_v14 = vpop.f32.mrf.mxu1 }
 0x2f0   :  { %v318_v15 = vadd.f32 %v314_v13, %v614_v5  ;;  %v309_v16 = vadd.f32 %v343_v11, %v308_v14 }
 0x2f2   :  { %320 = vst [vmem:[#allocation8 + $0x8] sm:$0xff] %v318_v15  ;;  %v317_v17 = vadd.f32 %v309_v16, %v612_v4 }
 0x2f4   :  { %319 = vst [vmem:[#allocation8] sm:$0xff] %v317_v17 }
 0x2f5   :  { %532 = shalt.err (!%p529_p5)
}
 0x2f6   :  { %332 = dma.vmem_to_hbm [thread:$0]  %s327_s22, 256, %s655_s7, [#allocation4], %s549_s29, %s549_s29, %s550_s30  }
 0x2f7   :  { %545 = dma.done.wait [#allocation4], 256  }
 0x2f8   :  { %546 = vsyncadd [#allocation4], 4294967040 }
 0x2f9   :  { %336 = vsyncpa [#allocation3], 1 }
 0x2fa   :  { %337 = vsyncpa [#allocation6], 1 }
 0x2fb   :  { %338 = vsyncpa [#allocation4], 1 }

</bundles_post_ra>
